<compile_context>
chip_gen: v7x
topology: tpu7x:2x2x1
jax: 0.10.0
libtpu: 0.0.40
codegen_flags: <defaults>
</compile_context>

<pallas_src>
import jax
import jax.numpy as jnp
from jax import lax
from jax.experimental import pallas as pl
from jax.experimental.pallas import tpu as pltpu


LANE = 128
SUB = 8                               # f32 sublane count; pixel pad granularity = 8*128
_ROWS_PER_BLOCK = 1024                # kernel-1 row tile: (1024,128) f32 = 512 KiB / plane
_RESIDENT_BYTES = 16 * 1024 * 1024    # kernel-2 VMEM-resident threshold (safe on v5e/v6e/v7x)
_CHUNK_ROWS = 512                     # in-VMEM scan chunk for the resident bisection
_SEARCH_ITERS = 32                    # bisection passes; 31 provably suffice for int32 range
_ROWS_PER_BLOCK_TOPN = 2048           # streaming-fallback row tile


# --------------------------------------------------------------------------
# Kernel 1: binary log-softmax + per-pixel losses + deferred reductions
# --------------------------------------------------------------------------
def _make_loss_kernel(p_valid, rb, needs_mask):
    rsub = rb // SUB                  # rb is always a multiple of 8 by construction

    def kernel(x_ref, t_ref,
               logneg_ref, pos_ref, ce_ref, npos_ref, mx_ref,
               acc_pos, acc_ce, acc_n, acc_mx):
        j = pl.program_id(1)
        nj = pl.num_programs(1)

        @pl.when(j == 0)
        def _init():
            acc_pos[...] = jnp.zeros_like(acc_pos)
            acc_ce[...] = jnp.zeros_like(acc_ce)
            acc_n[...] = jnp.zeros_like(acc_n)
            acc_mx[...] = jnp.zeros_like(acc_mx)

        x0 = x_ref[0].astype(jnp.float32)            # (rb, 128)
        x1 = x_ref[1].astype(jnp.float32)
        is_pos = t_ref[...] > 0                      # original integer target dtype

        # Binary-class -log_softmax closed form:
        #   nls1 = softplus(x0 - x1),  nls0 = nls1 - (x0 - x1)
        d = x0 - x1
        nls1 = jnp.maximum(d, 0.0) + jnp.log(1.0 + jnp.exp(-jnp.abs(d)))
        nls0 = nls1 - d

        pos_elem = jnp.where(is_pos, nls1, 0.0)      # shared selects; CE = pos + neg
        neg_elem = jnp.where(is_pos, 0.0, nls0)

        if needs_mask:
            # Only built when the shape is ragged (lane pad or partial last
            # block); the common aligned case skips this entire chain.
            row = lax.broadcasted_iota(jnp.int32, (rb, LANE), 0)
            lane = lax.broadcasted_iota(jnp.int32, (rb, LANE), 1)
            valid = (j * (rb * LANE) + row * LANE + lane) < p_valid
            pos_elem = jnp.where(valid, pos_elem, 0.0)
            neg_elem = jnp.where(valid, neg_elem, 0.0)
            vpos = valid & is_pos
        else:
            vpos = is_pos

        ce_elem = pos_elem + neg_elem
        logneg_ref[...] = neg_elem                   # lane-dense, unmasked stores

        # Fold each (rb,128) tile to (8,128) with pure vreg adds; the
        # cross-lane reduce happens once per image in _finalize.
        acc_pos[...] += jnp.sum(pos_elem.reshape(rsub, SUB, LANE), axis=0)
        acc_ce[...] += jnp.sum(ce_elem.reshape(rsub, SUB, LANE), axis=0)
        acc_n[...] += jnp.sum(vpos.astype(jnp.int32).reshape(rsub, SUB, LANE), axis=0)
        acc_mx[...] = jnp.maximum(acc_mx[...],
                                  jnp.max(neg_elem.reshape(rsub, SUB, LANE), axis=0))

        @pl.when(j == nj - 1)
        def _finalize():
            pos_ref[...] = jnp.zeros_like(pos_ref) + jnp.sum(acc_pos[...])
            ce_ref[...] = jnp.zeros_like(ce_ref) + jnp.sum(acc_ce[...])
            npos_ref[...] = jnp.zeros_like(npos_ref) + jnp.sum(acc_n[...])
            mx_ref[...] = jnp.zeros_like(mx_ref) + jnp.max(acc_mx[...])

    return kernel


# --------------------------------------------------------------------------
# Kernel 2a (main path): exact sum of the N largest log_neg values with the
# whole map resident in VMEM.  One HBM pass; all bisection passes run over
# the VMEM scratch inside lax.fori_loop.
# --------------------------------------------------------------------------
def _make_topn_resident_kernel(total_rows, padded_rows, chunk, n_iters):
    n_chunks = padded_rows // chunk
    csub = chunk // SUB

    def kernel(n_ref, hibits_ref, v_hbm, tbits_ref, cnt_ref, sum_ref, vbuf, sem):
        # Single HBM pass: land the whole log_neg map in VMEM.
        dst = vbuf if padded_rows == total_rows else vbuf.at[pl.ds(0, total_rows)]
        cp = pltpu.make_async_copy(v_hbm, dst, sem)
        cp.start()
        cp.wait()
        if padded_rows != total_rows:
            # Zero the pad tail: extra zero entries cannot change the top-N
            # sum because every real log_neg value is >= 0.
            vbuf[pl.ds(total_rows, padded_rows - total_rows), :] = jnp.zeros(
                (padded_rows - total_rows, LANE), jnp.float32)

        n = n_ref[0]

        def count_above(tbits):
            def cbody(c, acc):
                off = pl.multiple_of(c * chunk, chunk)
                bits = pltpu.bitcast(vbuf[pl.ds(off, chunk), :], jnp.int32)
                hit = (bits > tbits).astype(jnp.int32)
                return acc + jnp.sum(hit.reshape(csub, SUB, LANE), axis=0)
            acc = lax.fori_loop(0, n_chunks, cbody,
                                jnp.zeros((SUB, LANE), jnp.int32))
            return jnp.sum(acc)

        # Bitwise bisection: for non-negative f32 the int32 bit pattern is
        # order-isomorphic to the value.  Invariant: count(>lo) >= N,
        # count(>hi) < N.  hi is seeded from the max computed in kernel 1.
        def bisect(_, carry):
            lo, hi = carry
            mid = lo + ((hi - lo) >> 1)
            go_up = count_above(mid) >= n
            return (jnp.where(go_up, mid, lo), jnp.where(go_up, hi, mid))

        lo, hi = lax.fori_loop(0, n_iters, bisect,
                               (jnp.int32(-1), hibits_ref[0]))

        # Converged: hi is the bit pattern of t* (the exact N-th largest) and
        # {bits > lo} == {v >= t*}.  One more in-VMEM pass for count and sum.
        def fbody(c, carry):
            cacc, sacc = carry
            off = pl.multiple_of(c * chunk, chunk)
            v = vbuf[pl.ds(off, chunk), :]
            above = pltpu.bitcast(v, jnp.int32) > lo
            cacc = cacc + jnp.sum(above.astype(jnp.int32).reshape(csub, SUB, LANE),
                                  axis=0)
            sacc = sacc + jnp.sum(jnp.where(above, v, 0.0).reshape(csub, SUB, LANE),
                                  axis=0)
            return cacc, sacc

        cacc, sacc = lax.fori_loop(
            0, n_chunks, fbody,
            (jnp.zeros((SUB, LANE), jnp.int32), jnp.zeros((SUB, LANE), jnp.float32)))

        tbits_ref[...] = jnp.zeros_like(tbits_ref) + hi
        cnt_ref[...] = jnp.zeros_like(cnt_ref) + jnp.sum(cacc)
        sum_ref[...] = jnp.zeros_like(sum_ref) + jnp.sum(sacc)

    return kernel


def _topn_resident(v2, n_arg, hi_arg):
    total_rows = v2.shape[0]
    chunk = min(_CHUNK_ROWS, total_rows)
    padded_rows = pl.cdiv(total_rows, chunk) * chunk
    kernel = _make_topn_resident_kernel(total_rows, padded_rows, chunk, _SEARCH_ITERS)
    out_block = pl.BlockSpec((8, 128), lambda i, n, h: (0, 0))
    return pl.pallas_call(
        kernel,
        out_shape=(
            jax.ShapeDtypeStruct((8, 128), jnp.int32),    # bit pattern of t*
            jax.ShapeDtypeStruct((8, 128), jnp.int32),    # count(log_neg >= t*)
            jax.ShapeDtypeStruct((8, 128), jnp.float32),  # sum(log_neg >= t*)
        ),
        grid_spec=pltpu.PrefetchScalarGridSpec(
            num_scalar_prefetch=2,
            grid=(1,),
            in_specs=[pl.BlockSpec(memory_space=pl.ANY)],
            out_specs=[out_block, out_block, out_block],
            scratch_shapes=[
                pltpu.VMEM((padded_rows, LANE), jnp.float32),
                pltpu.SemaphoreType.DMA,
            ],
        ),
        compiler_params=pltpu.CompilerParams(
            dimension_semantics=("arbitrary",),
            vmem_limit_bytes=32 * 1024 * 1024),
    )(n_arg, hi_arg, v2)


# --------------------------------------------------------------------------
# Kernel 2b (fallback): streaming bitwise bisection when log_neg does not fit
# in VMEM.  Verbatim from the verified v2 kernel.
# TODO(synk): for the streaming path, store log_neg as bf16 and/or use a
# multi-way bisection to cut the 33x HBM traffic (perf-review item 2).
# --------------------------------------------------------------------------
def _make_topn_streaming_kernel(total_rows, r2, n_search):
    def kernel(n_ref, hibits_ref, v_ref,
               tbits_ref, cnt_ref, sum_ref,
               acc_cnt, acc_sum, lo_st, hi_st):
        it = pl.program_id(0)
        j = pl.program_id(1)
        nj = pl.num_programs(1)

        @pl.when((it == 0) & (j == 0))
        def _init_state():
            lo_st[...] = jnp.full_like(lo_st, -1)            # below every value >= 0
            hi_st[...] = jnp.zeros_like(hi_st) + hibits_ref[0]

        @pl.when(j == 0)
        def _init_acc():
            acc_cnt[...] = jnp.zeros_like(acc_cnt)
            acc_sum[...] = jnp.zeros_like(acc_sum)

        lo = lo_st[...]                                       # (1, 128) int32
        hi = hi_st[...]
        mid = lo + ((hi - lo) >> 1)                           # == lo once converged

        row = j * r2 + lax.broadcasted_iota(jnp.int32, (r2, LANE), 0)
        rvalid = row < total_rows                             # mask ragged edge block

        v = v_ref[...]                                        # (r2, 128) f32, all >= 0
        vbits = pltpu.bitcast(v, jnp.int32)                   # order-isomorphic for v >= 0
        above = (vbits > mid) & rvalid
        acc_cnt[...] += above.astype(jnp.int32)
        acc_sum[...] += jnp.where(above, v, 0.0)

        searching = it < n_search

        @pl.when((j == nj - 1) & searching)
        def _bisect():
            active = (hi - lo) > 1
            go_up = jnp.sum(acc_cnt[...]) >= n_ref[0]
            lo_st[...] = jnp.where(active & go_up, mid, lo)
            hi_st[...] = jnp.where(active & jnp.logical_not(go_up), mid, hi)

        @pl.when((j == nj - 1) & jnp.logical_not(searching))
        def _finalize():
            tbits_ref[...] = jnp.zeros_like(tbits_ref) + hi
            cnt_ref[...] = jnp.zeros_like(cnt_ref) + jnp.sum(acc_cnt[...])
            sum_ref[...] = jnp.zeros_like(sum_ref) + jnp.sum(acc_sum[...])

    return kernel


def _topn_streaming(v2, n_arg, hi_arg):
    total_rows = v2.shape[0]
    r2 = min(_ROWS_PER_BLOCK_TOPN, total_rows)
    nj2 = pl.cdiv(total_rows, r2)
    kernel = _make_topn_streaming_kernel(total_rows, r2, _SEARCH_ITERS)
    out_block = pl.BlockSpec((8, 128), lambda it, j, n, h: (0, 0))
    return pl.pallas_call(
        kernel,
        out_shape=(
            jax.ShapeDtypeStruct((8, 128), jnp.int32),
            jax.ShapeDtypeStruct((8, 128), jnp.int32),
            jax.ShapeDtypeStruct((8, 128), jnp.float32),
        ),
        grid_spec=pltpu.PrefetchScalarGridSpec(
            num_scalar_prefetch=2,
            grid=(_SEARCH_ITERS + 1, nj2),
            in_specs=[pl.BlockSpec((r2, LANE), lambda it, j, n, h: (j, 0))],
            out_specs=[out_block, out_block, out_block],
            scratch_shapes=[
                pltpu.VMEM((r2, LANE), jnp.int32),
                pltpu.VMEM((r2, LANE), jnp.float32),
                pltpu.VMEM((1, LANE), jnp.int32),
                pltpu.VMEM((1, LANE), jnp.int32),
            ],
        ),
        compiler_params=pltpu.CompilerParams(
            dimension_semantics=("arbitrary", "arbitrary")),
    )(n_arg, hi_arg, v2)


# --------------------------------------------------------------------------
# Wrapper
# --------------------------------------------------------------------------
@jax.jit
def balance_nll_loss(x, target):
    """x: (B, 2, H, W) float logits (NCHW); target: (B, H, W) in {0, 1}."""
    B, C, H, W = x.shape
    if C != 2:
        raise ValueError("BalanceNLLLoss kernel assumes binary classification (C == 2).")
    P = H * W
    p_pad = pl.cdiv(P, SUB * LANE) * (SUB * LANE)   # pad pixels to whole (8,128) subtiles
    rows = p_pad // LANE                            # multiple of 8

    x3 = x.reshape(B, C, P)
    t3 = target.reshape(B, P)
    if p_pad != P:
        # TODO(synk): per perf review, handle the ragged tail fully in-kernel
        # (flat lane-major blocks) instead of this extra pad copy.
        x3 = jnp.pad(x3, ((0, 0), (0, 0), (0, p_pad - P)))
        t3 = jnp.pad(t3, ((0, 0), (0, p_pad - P)))
    x4 = x3.reshape(B, C, rows, LANE)
    t4 = t3.reshape(B, rows, LANE)

    rb = min(_ROWS_PER_BLOCK, rows)                 # multiple of 8
    nj = pl.cdiv(rows, rb)
    needs_mask = (p_pad != P) or (rows % rb != 0)

    kernel1 = _make_loss_kernel(P, rb, needs_mask)
    stats_block = pl.BlockSpec((pl.Squeezed(), 8, 128), lambda b, j: (b, 0, 0))
    log_neg, pos_p, ce_p, n_p, mx_p = pl.pallas_call(
        kernel1,
        out_shape=(
            jax.ShapeDtypeStruct((B, rows, LANE), jnp.float32),   # log_neg map
            jax.ShapeDtypeStruct((B, 8, 128), jnp.float32),       # loss_pos partial
            jax.ShapeDtypeStruct((B, 8, 128), jnp.float32),       # cross-entropy partial
            jax.ShapeDtypeStruct((B, 8, 128), jnp.int32),         # positive count
            jax.ShapeDtypeStruct((B, 8, 128), jnp.float32),       # max(log_neg)
        ),
        grid_spec=pltpu.PrefetchScalarGridSpec(
            num_scalar_prefetch=0,
            grid=(B, nj),
            in_specs=[
                pl.BlockSpec((pl.Squeezed(), C, rb, LANE), lambda b, j: (b, 0, j, 0)),
                pl.BlockSpec((pl.Squeezed(), rb, LANE), lambda b, j: (b, j, 0)),
            ],
            out_specs=[
                pl.BlockSpec((pl.Squeezed(), rb, LANE), lambda b, j: (b, j, 0)),
                stats_block, stats_block, stats_block, stats_block,
            ],
            scratch_shapes=[
                pltpu.VMEM((8, LANE), jnp.float32),
                pltpu.VMEM((8, LANE), jnp.float32),
                pltpu.VMEM((8, LANE), jnp.int32),
                pltpu.VMEM((8, LANE), jnp.float32),
            ],
        ),
        compiler_params=pltpu.CompilerParams(
            dimension_semantics=("parallel", "arbitrary")),
    )(x4, t4)

    loss_pos = jnp.sum(pos_p[:, 0, 0])
    ce_sum = jnp.sum(ce_p[:, 0, 0])
    n_total = jnp.sum(n_p[:, 0, 0])                 # int32, exact count
    mx = jnp.max(mx_p[:, 0, 0])

    # ---- loss_neg = sum of the N largest log_neg values (sort-free) ----
    total_rows = B * rows
    v2 = log_neg.reshape(total_rows, LANE)          # free reshape
    n_arg = n_total.reshape(1)
    hi_arg = lax.bitcast_convert_type(mx, jnp.int32).reshape(1)

    if total_rows * LANE * 4 <= _RESIDENT_BYTES:
        tbits, cnt, ssum = _topn_resident(v2, n_arg, hi_arg)
    else:
        tbits, cnt, ssum = _topn_streaming(v2, n_arg, hi_arg)

    t_star = lax.bitcast_convert_type(tbits[0, 0], jnp.float32)
    loss_neg = ssum[0, 0] - (cnt[0, 0] - n_total).astype(jnp.float32) * t_star

    n_f = n_total.astype(jnp.float32)
    denom = 2.0 * jnp.maximum(n_f, 1.0)             # guard N == 0 (reference would NaN)
    ce_mean = ce_sum / jnp.float32(B * P)           # F.cross_entropy, reduction='mean'
    return (loss_pos + loss_neg) / denom + ce_mean


# --------------------------------------------------------------------------
# Pure-JAX reference (mirrors the PyTorch module) for a correctness check
# --------------------------------------------------------------------------
def _ref_loss(x, target):
    nls = -jax.nn.log_softmax(x.astype(jnp.float32), axis=1)     # (B, C, H, W)
    t = target.astype(jnp.float32)
    loss_pos = jnp.sum(nls[:, 1] * t)
    N = jnp.sum(t)
    log_neg = (nls[:, 0] * (1.0 - t)).reshape(-1)
    sorted_desc = -jnp.sort(-log_neg)
    keep = jnp.arange(log_neg.shape[0]) < N
    loss_neg = jnp.sum(jnp.where(keep, sorted_desc, 0.0))
    ce = jnp.mean(jnp.where(t > 0.5, nls[:, 1], nls[:, 0]))
    return (loss_pos + loss_neg) / (2.0 * N) + ce


if __name__ == "__main__":
    key = jax.random.PRNGKey(0)
    kx, kt = jax.random.split(key)

    B, C, H, W = 2, 2, 16, 16
    x = jax.random.normal(kx, (B, C, H, W), dtype=jnp.float32)
    target = (jax.random.uniform(kt, (B, H, W)) < 0.3).astype(jnp.int32)

    out = jax.block_until_ready(balance_nll_loss(x, target))
    ref = jax.block_until_ready(_ref_loss(x, target))
    assert jnp.allclose(out, ref, rtol=1e-4, atol=1e-5), (out, ref)

    print("KERNEL_OK")
</pallas_src>

<mosaic_0001>
module attributes {stable_mosaic.version = 11 : i64} {
  func.func @kernel(%arg0: i32, %arg1: i32, %arg2: memref<1x2x8x128xf32, #tpu.memory_space<vmem>>, %arg3: memref<1x8x128xi32, #tpu.memory_space<vmem>>, %arg4: memref<1x8x128xf32, #tpu.memory_space<vmem>>, %arg5: memref<1x8x128xf32, #tpu.memory_space<vmem>>, %arg6: memref<1x8x128xf32, #tpu.memory_space<vmem>>, %arg7: memref<1x8x128xi32, #tpu.memory_space<vmem>>, %arg8: memref<1x8x128xf32, #tpu.memory_space<vmem>>, %arg9: memref<8x128xf32, #tpu.memory_space<vmem>>, %arg10: memref<8x128xf32, #tpu.memory_space<vmem>>, %arg11: memref<8x128xi32, #tpu.memory_space<vmem>>, %arg12: memref<8x128xf32, #tpu.memory_space<vmem>>) attributes {dimension_semantics = [#tpu.dimension_semantics<parallel>, #tpu.dimension_semantics<arbitrary>], iteration_bounds = array<i64: 2, 1>, scalar_prefetch = 0 : i64, scratch_operands = 4 : i64, tpu.core_type = #tpu.core_type<tc>, window_params = [{transform_indices = @transform_0, window_bounds = array<i64: 1, 2, 8, 128>}, {transform_indices = @transform_1, window_bounds = array<i64: 1, 8, 128>}, {transform_indices = @transform_2, window_bounds = array<i64: 1, 8, 128>}, {transform_indices = @transform_3, window_bounds = array<i64: 1, 8, 128>}, {transform_indices = @transform_4, window_bounds = array<i64: 1, 8, 128>}, {transform_indices = @transform_5, window_bounds = array<i64: 1, 8, 128>}, {transform_indices = @transform_6, window_bounds = array<i64: 1, 8, 128>}]} {
    %c0_i32 = arith.constant 0 : i32
    %0 = arith.cmpi eq, %arg1, %c0_i32 : i32
    %1 = arith.extui %0 : i1 to i32
    %c0_i32_0 = arith.constant 0 : i32
    %2 = arith.cmpi ne, %1, %c0_i32_0 : i32
    scf.if %2 {
      %cst_42 = arith.constant 0.000000e+00 : f32
      %70 = vector.broadcast %cst_42 : f32 to vector<8x128xf32>
      %c0_43 = arith.constant 0 : index
      %c0_44 = arith.constant 0 : index
      %71 = vector.load %arg9[%c0_43, %c0_44] : memref<8x128xf32, #tpu.memory_space<vmem>>, vector<8x128xf32>
      tpu.vector_store %arg9[%c0_43, %c0_44], %70 {strides = array<i32>} : memref<8x128xf32, #tpu.memory_space<vmem>>, vector<8x128xf32>,
      %cst_45 = arith.constant 0.000000e+00 : f32
      %72 = vector.broadcast %cst_45 : f32 to vector<8x128xf32>
      %c0_46 = arith.constant 0 : index
      %c0_47 = arith.constant 0 : index
      %73 = vector.load %arg10[%c0_46, %c0_47] : memref<8x128xf32, #tpu.memory_space<vmem>>, vector<8x128xf32>
      tpu.vector_store %arg10[%c0_46, %c0_47], %72 {strides = array<i32>} : memref<8x128xf32, #tpu.memory_space<vmem>>, vector<8x128xf32>,
      %c0_i32_48 = arith.constant 0 : i32
      %74 = vector.broadcast %c0_i32_48 : i32 to vector<8x128xi32>
      %c0_49 = arith.constant 0 : index
      %c0_50 = arith.constant 0 : index
      %75 = vector.load %arg11[%c0_49, %c0_50] : memref<8x128xi32, #tpu.memory_space<vmem>>, vector<8x128xi32>
      tpu.vector_store %arg11[%c0_49, %c0_50], %74 {strides = array<i32>} : memref<8x128xi32, #tpu.memory_space<vmem>>, vector<8x128xi32>,
      %cst_51 = arith.constant 0.000000e+00 : f32
      %76 = vector.broadcast %cst_51 : f32 to vector<8x128xf32>
      %c0_52 = arith.constant 0 : index
      %c0_53 = arith.constant 0 : index
      %77 = vector.load %arg12[%c0_52, %c0_53] : memref<8x128xf32, #tpu.memory_space<vmem>>, vector<8x128xf32>
      tpu.vector_store %arg12[%c0_52, %c0_53], %76 {strides = array<i32>} : memref<8x128xf32, #tpu.memory_space<vmem>>, vector<8x128xf32>,
    } else {
    }
    %c0 = arith.constant 0 : index
    %c0_1 = arith.constant 0 : index
    %c0_2 = arith.constant 0 : index
    %c0_3 = arith.constant 0 : index
    %3 = vector.load %arg2[%c0, %c0_1, %c0_2, %c0_3] : memref<1x2x8x128xf32, #tpu.memory_space<vmem>>, vector<1x1x8x128xf32>
    %4 = vector.shape_cast %3 : vector<1x1x8x128xf32> to vector<8x128xf32>
    %c0_4 = arith.constant 0 : index
    %c1 = arith.constant 1 : index
    %c0_5 = arith.constant 0 : index
    %c0_6 = arith.constant 0 : index
    %5 = vector.load %arg2[%c0_4, %c1, %c0_5, %c0_6] : memref<1x2x8x128xf32, #tpu.memory_space<vmem>>, vector<1x1x8x128xf32>
    %6 = vector.shape_cast %5 : vector<1x1x8x128xf32> to vector<8x128xf32>
    %c0_7 = arith.constant 0 : index
    %c0_8 = arith.constant 0 : index
    %c0_9 = arith.constant 0 : index
    %7 = vector.load %arg3[%c0_7, %c0_8, %c0_9] : memref<1x8x128xi32, #tpu.memory_space<vmem>>, vector<1x8x128xi32>
    %8 = vector.shape_cast %7 : vector<1x8x128xi32> to vector<8x128xi32>
    %c0_i32_10 = arith.constant 0 : i32
    %9 = vector.broadcast %c0_i32_10 : i32 to vector<8x128xi32>
    %10 = arith.cmpi sgt, %8, %9 : vector<8x128xi32>
    %11 = arith.subf %4, %6 : vector<8x128xf32>
    %cst = arith.constant 0.000000e+00 : f32
    %12 = vector.broadcast %cst : f32 to vector<8x128xf32>
    %13 = arith.maximumf %11, %12 : vector<8x128xf32>
    %14 = math.absf %11 : vector<8x128xf32>
    %cst_11 = arith.constant 0.000000e+00 : f32
    %15 = vector.broadcast %cst_11 : f32 to vector<8x128xf32>
    %16 = arith.subf %15, %14 : vector<8x128xf32>
    %17 = math.exp %16 : vector<8x128xf32>
    %cst_12 = arith.constant 1.000000e+00 : f32
    %18 = vector.broadcast %cst_12 : f32 to vector<8x128xf32>
    %19 = arith.addf %18, %17 : vector<8x128xf32>
    %20 = math.log %19 : vector<8x128xf32>
    %21 = arith.addf %13, %20 : vector<8x128xf32>
    %22 = arith.subf %21, %11 : vector<8x128xf32>
    %cst_13 = arith.constant 0.000000e+00 : f32
    %23 = vector.broadcast %cst_13 : f32 to vector<8x128xf32>
    %24 = arith.select %10, %21, %23 : vector<8x128xi1>, vector<8x128xf32>
    %cst_14 = arith.constant 0.000000e+00 : f32
    %25 = vector.broadcast %cst_14 : f32 to vector<8x128xf32>
    %26 = arith.select %10, %25, %22 : vector<8x128xi1>, vector<8x128xf32>
    %27 = tpu.iota {dimensions = array<i32: 0>} : vector<8x128xi32>
    %28 = tpu.iota {dimensions = array<i32: 1>} : vector<8x128xi32>
    %c1024_i32 = arith.constant 1024 : i32
    %29 = arith.muli %arg1, %c1024_i32 : i32
    %c128_i32 = arith.constant 128 : i32
    %30 = vector.broadcast %c128_i32 : i32 to vector<8x128xi32>
    %31 = arith.muli %27, %30 : vector<8x128xi32>
    %32 = vector.broadcast %29 : i32 to vector<8x128xi32>
    %33 = arith.addi %32, %31 : vector<8x128xi32>
    %34 = arith.addi %33, %28 : vector<8x128xi32>
    %c256_i32 = arith.constant 256 : i32
    %35 = vector.broadcast %c256_i32 : i32 to vector<8x128xi32>
    %36 = arith.cmpi slt, %34, %35 : vector<8x128xi32>
    %cst_15 = arith.constant 0.000000e+00 : f32
    %37 = vector.broadcast %cst_15 : f32 to vector<8x128xf32>
    %38 = arith.select %36, %24, %37 : vector<8x128xi1>, vector<8x128xf32>
    %cst_16 = arith.constant 0.000000e+00 : f32
    %39 = vector.broadcast %cst_16 : f32 to vector<8x128xf32>
    %40 = arith.select %36, %26, %39 : vector<8x128xi1>, vector<8x128xf32>
    %41 = arith.andi %36, %10 : vector<8x128xi1>
    %42 = arith.addf %38, %40 : vector<8x128xf32>
    %c0_17 = arith.constant 0 : index
    %c0_18 = arith.constant 0 : index
    %c0_19 = arith.constant 0 : index
    %43 = vector.load %arg4[%c0_17, %c0_18, %c0_19] : memref<1x8x128xf32, #tpu.memory_space<vmem>>, vector<1x8x128xf32>
    %44 = vector.shape_cast %43 : vector<1x8x128xf32> to vector<8x128xf32>
    %45 = vector.shape_cast %40 : vector<8x128xf32> to vector<1x8x128xf32>
    tpu.vector_store %arg4[%c0_17, %c0_18, %c0_19], %45 {strides = array<i32>} : memref<1x8x128xf32, #tpu.memory_space<vmem>>, vector<1x8x128xf32>,
    %c0_20 = arith.constant 0 : index
    %c0_21 = arith.constant 0 : index
    %46 = vector.load %arg9[%c0_20, %c0_21] : memref<8x128xf32, #tpu.memory_space<vmem>>, vector<8x128xf32>
    %47 = vector.shape_cast %38 : vector<8x128xf32> to vector<1x8x128xf32>
    %cst_22 = arith.constant dense<0.000000e+00> : vector<8x128xf32>
    %48 = vector.multi_reduction <add>, %47, %cst_22 [0] : vector<1x8x128xf32> to vector<8x128xf32>
    %49 = arith.addf %46, %48 : vector<8x128xf32>
    %c0_23 = arith.constant 0 : index
    %c0_24 = arith.constant 0 : index
    %50 = vector.load %arg9[%c0_23, %c0_24] : memref<8x128xf32, #tpu.memory_space<vmem>>, vector<8x128xf32>
    tpu.vector_store %arg9[%c0_23, %c0_24], %49 {strides = array<i32>} : memref<8x128xf32, #tpu.memory_space<vmem>>, vector<8x128xf32>,
    %c0_25 = arith.constant 0 : index
    %c0_26 = arith.constant 0 : index
    %51 = vector.load %arg10[%c0_25, %c0_26] : memref<8x128xf32, #tpu.memory_space<vmem>>, vector<8x128xf32>
    %52 = vector.shape_cast %42 : vector<8x128xf32> to vector<1x8x128xf32>
    %cst_27 = arith.constant dense<0.000000e+00> : vector<8x128xf32>
    %53 = vector.multi_reduction <add>, %52, %cst_27 [0] : vector<1x8x128xf32> to vector<8x128xf32>
    %54 = arith.addf %51, %53 : vector<8x128xf32>
    %c0_28 = arith.constant 0 : index
    %c0_29 = arith.constant 0 : index
    %55 = vector.load %arg10[%c0_28, %c0_29] : memref<8x128xf32, #tpu.memory_space<vmem>>, vector<8x128xf32>
    tpu.vector_store %arg10[%c0_28, %c0_29], %54 {strides = array<i32>} : memref<8x128xf32, #tpu.memory_space<vmem>>, vector<8x128xf32>,
    %c0_30 = arith.constant 0 : index
    %c0_31 = arith.constant 0 : index
    %56 = vector.load %arg11[%c0_30, %c0_31] : memref<8x128xi32, #tpu.memory_space<vmem>>, vector<8x128xi32>
    %57 = arith.extui %41 : vector<8x128xi1> to vector<8x128xi32>
    %58 = vector.shape_cast %57 : vector<8x128xi32> to vector<1x8x128xi32>
    %cst_32 = arith.constant dense<0> : vector<8x128xi32>
    %59 = vector.multi_reduction <add>, %58, %cst_32 [0] : vector<1x8x128xi32> to vector<8x128xi32>
    %60 = arith.addi %56, %59 : vector<8x128xi32>
    %c0_33 = arith.constant 0 : index
    %c0_34 = arith.constant 0 : index
    %61 = vector.load %arg11[%c0_33, %c0_34] : memref<8x128xi32, #tpu.memory_space<vmem>>, vector<8x128xi32>
    tpu.vector_store %arg11[%c0_33, %c0_34], %60 {strides = array<i32>} : memref<8x128xi32, #tpu.memory_space<vmem>>, vector<8x128xi32>,
    %c0_35 = arith.constant 0 : index
    %c0_36 = arith.constant 0 : index
    %62 = vector.load %arg12[%c0_35, %c0_36] : memref<8x128xf32, #tpu.memory_space<vmem>>, vector<8x128xf32>
    %63 = vector.shape_cast %40 : vector<8x128xf32> to vector<1x8x128xf32>
    %cst_37 = arith.constant dense<0xFF800000> : vector<8x128xf32>
    %64 = vector.multi_reduction <maximumf>, %63, %cst_37 [0] : vector<1x8x128xf32> to vector<8x128xf32>
    %65 = arith.maximumf %62, %64 : vector<8x128xf32>
    %c0_38 = arith.constant 0 : index
    %c0_39 = arith.constant 0 : index
    %66 = vector.load %arg12[%c0_38, %c0_39] : memref<8x128xf32, #tpu.memory_space<vmem>>, vector<8x128xf32>
    tpu.vector_store %arg12[%c0_38, %c0_39], %65 {strides = array<i32>} : memref<8x128xf32, #tpu.memory_space<vmem>>, vector<8x128xf32>,
    %c0_i32_40 = arith.constant 0 : i32
    %67 = arith.cmpi eq, %arg1, %c0_i32_40 : i32
    %68 = arith.extui %67 : i1 to i32
    %c0_i32_41 = arith.constant 0 : i32
    %69 = arith.cmpi ne, %68, %c0_i32_41 : i32
    scf.if %69 {
      %cst_42 = arith.constant 0.000000e+00 : f32
      %70 = vector.broadcast %cst_42 : f32 to vector<8x128xf32>
      %c0_43 = arith.constant 0 : index
      %c0_44 = arith.constant 0 : index
      %71 = vector.load %arg9[%c0_43, %c0_44] : memref<8x128xf32, #tpu.memory_space<vmem>>, vector<8x128xf32>
      %72 = vector.shape_cast %71 : vector<8x128xf32> to vector<1x8x128xf32>
      %cst_45 = arith.constant dense<0.000000e+00> : vector<1xf32>
      %73 = vector.multi_reduction <add>, %72, %cst_45 [1, 2] : vector<1x8x128xf32> to vector<1xf32>
      %74 = vector.shape_cast %73 : vector<1xf32> to vector<1x1x1xf32>
      %75 = vector.extract %74[0, 0, 0] : f32 from vector<1x1x1xf32>
      %76 = vector.broadcast %75 : f32 to vector<8x128xf32>
      %77 = arith.addf %70, %76 : vector<8x128xf32>
      %c0_46 = arith.constant 0 : index
      %c0_47 = arith.constant 0 : index
      %c0_48 = arith.constant 0 : index
      %78 = vector.load %arg5[%c0_46, %c0_47, %c0_48] : memref<1x8x128xf32, #tpu.memory_space<vmem>>, vector<1x8x128xf32>
      %79 = vector.shape_cast %78 : vector<1x8x128xf32> to vector<8x128xf32>
      %80 = vector.shape_cast %77 : vector<8x128xf32> to vector<1x8x128xf32>
      tpu.vector_store %arg5[%c0_46, %c0_47, %c0_48], %80 {strides = array<i32>} : memref<1x8x128xf32, #tpu.memory_space<vmem>>, vector<1x8x128xf32>,
      %cst_49 = arith.constant 0.000000e+00 : f32
      %81 = vector.broadcast %cst_49 : f32 to vector<8x128xf32>
      %c0_50 = arith.constant 0 : index
      %c0_51 = arith.constant 0 : index
      %82 = vector.load %arg10[%c0_50, %c0_51] : memref<8x128xf32, #tpu.memory_space<vmem>>, vector<8x128xf32>
      %83 = vector.shape_cast %82 : vector<8x128xf32> to vector<1x8x128xf32>
      %cst_52 = arith.constant dense<0.000000e+00> : vector<1xf32>
      %84 = vector.multi_reduction <add>, %83, %cst_52 [1, 2] : vector<1x8x128xf32> to vector<1xf32>
      %85 = vector.shape_cast %84 : vector<1xf32> to vector<1x1x1xf32>
      %86 = vector.extract %85[0, 0, 0] : f32 from vector<1x1x1xf32>
      %87 = vector.broadcast %86 : f32 to vector<8x128xf32>
      %88 = arith.addf %81, %87 : vector<8x128xf32>
      %c0_53 = arith.constant 0 : index
      %c0_54 = arith.constant 0 : index
      %c0_55 = arith.constant 0 : index
      %89 = vector.load %arg6[%c0_53, %c0_54, %c0_55] : memref<1x8x128xf32, #tpu.memory_space<vmem>>, vector<1x8x128xf32>
      %90 = vector.shape_cast %89 : vector<1x8x128xf32> to vector<8x128xf32>
      %91 = vector.shape_cast %88 : vector<8x128xf32> to vector<1x8x128xf32>
      tpu.vector_store %arg6[%c0_53, %c0_54, %c0_55], %91 {strides = array<i32>} : memref<1x8x128xf32, #tpu.memory_space<vmem>>, vector<1x8x128xf32>,
      %c0_i32_56 = arith.constant 0 : i32
      %92 = vector.broadcast %c0_i32_56 : i32 to vector<8x128xi32>
      %c0_57 = arith.constant 0 : index
      %c0_58 = arith.constant 0 : index
      %93 = vector.load %arg11[%c0_57, %c0_58] : memref<8x128xi32, #tpu.memory_space<vmem>>, vector<8x128xi32>
      %94 = vector.shape_cast %93 : vector<8x128xi32> to vector<1x8x128xi32>
      %cst_59 = arith.constant dense<0> : vector<1xi32>
      %95 = vector.multi_reduction <add>, %94, %cst_59 [1, 2] : vector<1x8x128xi32> to vector<1xi32>
      %96 = vector.shape_cast %95 : vector<1xi32> to vector<1x1x1xi32>
      %97 = vector.extract %96[0, 0, 0] : i32 from vector<1x1x1xi32>
      %98 = vector.broadcast %97 : i32 to vector<8x128xi32>
      %99 = arith.addi %92, %98 : vector<8x128xi32>
      %c0_60 = arith.constant 0 : index
      %c0_61 = arith.constant 0 : index
      %c0_62 = arith.constant 0 : index
      %100 = vector.load %arg7[%c0_60, %c0_61, %c0_62] : memref<1x8x128xi32, #tpu.memory_space<vmem>>, vector<1x8x128xi32>
      %101 = vector.shape_cast %100 : vector<1x8x128xi32> to vector<8x128xi32>
      %102 = vector.shape_cast %99 : vector<8x128xi32> to vector<1x8x128xi32>
      tpu.vector_store %arg7[%c0_60, %c0_61, %c0_62], %102 {strides = array<i32>} : memref<1x8x128xi32, #tpu.memory_space<vmem>>, vector<1x8x128xi32>,
      %cst_63 = arith.constant 0.000000e+00 : f32
      %103 = vector.broadcast %cst_63 : f32 to vector<8x128xf32>
      %c0_64 = arith.constant 0 : index
      %c0_65 = arith.constant 0 : index
      %104 = vector.load %arg12[%c0_64, %c0_65] : memref<8x128xf32, #tpu.memory_space<vmem>>, vector<8x128xf32>
      %105 = vector.shape_cast %104 : vector<8x128xf32> to vector<1x8x128xf32>
      %cst_66 = arith.constant dense<0xFF800000> : vector<1xf32>
      %106 = vector.multi_reduction <maximumf>, %105, %cst_66 [1, 2] : vector<1x8x128xf32> to vector<1xf32>
      %107 = vector.shape_cast %106 : vector<1xf32> to vector<1x1x1xf32>
      %108 = vector.extract %107[0, 0, 0] : f32 from vector<1x1x1xf32>
      %109 = vector.broadcast %108 : f32 to vector<8x128xf32>
      %110 = arith.addf %103, %109 : vector<8x128xf32>
      %c0_67 = arith.constant 0 : index
      %c0_68 = arith.constant 0 : index
      %c0_69 = arith.constant 0 : index
      %111 = vector.load %arg8[%c0_67, %c0_68, %c0_69] : memref<1x8x128xf32, #tpu.memory_space<vmem>>, vector<1x8x128xf32>
      %112 = vector.shape_cast %111 : vector<1x8x128xf32> to vector<8x128xf32>
      %113 = vector.shape_cast %110 : vector<8x128xf32> to vector<1x8x128xf32>
      tpu.vector_store %arg8[%c0_67, %c0_68, %c0_69], %113 {strides = array<i32>} : memref<1x8x128xf32, #tpu.memory_space<vmem>>, vector<1x8x128xf32>,
    } else {
    }
    return
  }
  func.func @transform_0(%arg0: i32, %arg1: i32) -> (i32, i32, i32, i32) {
    %c0_i32 = arith.constant 0 : i32
    %c0_i32_0 = arith.constant 0 : i32
    %c0_i32_1 = arith.constant 0 : i32
    return %arg0, %c0_i32, %arg1, %c0_i32_0 : i32, i32, i32, i32
  }
  func.func @transform_1(%arg0: i32, %arg1: i32) -> (i32, i32, i32) {
    %c0_i32 = arith.constant 0 : i32
    %c0_i32_0 = arith.constant 0 : i32
    return %arg0, %arg1, %c0_i32 : i32, i32, i32
  }
  func.func @transform_2(%arg0: i32, %arg1: i32) -> (i32, i32, i32) {
    %c0_i32 = arith.constant 0 : i32
    %c0_i32_0 = arith.constant 0 : i32
    return %arg0, %arg1, %c0_i32 : i32, i32, i32
  }
  func.func @transform_3(%arg0: i32, %arg1: i32) -> (i32, i32, i32) {
    %c0_i32 = arith.constant 0 : i32
    %c0_i32_0 = arith.constant 0 : i32
    %c0_i32_1 = arith.constant 0 : i32
    return %arg0, %c0_i32, %c0_i32_0 : i32, i32, i32
  }
  func.func @transform_4(%arg0: i32, %arg1: i32) -> (i32, i32, i32) {
    %c0_i32 = arith.constant 0 : i32
    %c0_i32_0 = arith.constant 0 : i32
    %c0_i32_1 = arith.constant 0 : i32
    return %arg0, %c0_i32, %c0_i32_0 : i32, i32, i32
  }
  func.func @transform_5(%arg0: i32, %arg1: i32) -> (i32, i32, i32) {
    %c0_i32 = arith.constant 0 : i32
    %c0_i32_0 = arith.constant 0 : i32
    %c0_i32_1 = arith.constant 0 : i32
    return %arg0, %c0_i32, %c0_i32_0 : i32, i32, i32
  }
  func.func @transform_6(%arg0: i32, %arg1: i32) -> (i32, i32, i32) {
    %c0_i32 = arith.constant 0 : i32
    %c0_i32_0 = arith.constant 0 : i32
    %c0_i32_1 = arith.constant 0 : i32
    return %arg0, %c0_i32, %c0_i32_0 : i32, i32, i32
  }
}

module attributes {stable_mosaic.version = 11 : i64} {
  func.func @kernel(%arg0: i32, %arg1: memref<1xi32, #tpu.memory_space<smem>>, %arg2: memref<1xi32, #tpu.memory_space<smem>>, %arg3: memref<16x128xf32, #tpu.memory_space<any>>, %arg4: memref<8x128xi32, #tpu.memory_space<vmem>>, %arg5: memref<8x128xi32, #tpu.memory_space<vmem>>, %arg6: memref<8x128xf32, #tpu.memory_space<vmem>>, %arg7: memref<16x128xf32, #tpu.memory_space<vmem>>, %arg8: memref<!tpu.dma_semaphore, #tpu.memory_space<semaphore_mem>>) attributes {dimension_semantics = [#tpu.dimension_semantics<arbitrary>], iteration_bounds = array<i64: 1>, scalar_prefetch = 2 : i64, scratch_operands = 2 : i64, tpu.core_type = #tpu.core_type<tc>, window_params = [{}, {pipeline_mode = #tpu.pipeline_mode<synchronous>, transform_indices = @transform_1, window_bounds = array<i64: 8, 128>}, {pipeline_mode = #tpu.pipeline_mode<synchronous>, transform_indices = @transform_2, window_bounds = array<i64: 8, 128>}, {pipeline_mode = #tpu.pipeline_mode<synchronous>, transform_indices = @transform_3, window_bounds = array<i64: 8, 128>}]} {
    tpu.enqueue_dma source(%arg3 : memref<16x128xf32, #tpu.memory_space<any>>) target(%arg7 : memref<16x128xf32, #tpu.memory_space<vmem>>) target_semaphore(%arg8 : memref<!tpu.dma_semaphore, #tpu.memory_space<semaphore_mem>>)
    tpu.wait_dma2 semaphore(%arg8 : memref<!tpu.dma_semaphore, #tpu.memory_space<semaphore_mem>>) src(%arg3 : memref<16x128xf32, #tpu.memory_space<any>>) dst(%arg7 : memref<16x128xf32, #tpu.memory_space<vmem>>)
    %c0 = arith.constant 0 : index
    %0 = memref.load %arg1[%c0] : memref<1xi32, #tpu.memory_space<smem>>
    %c0_0 = arith.constant 0 : index
    %1 = memref.load %arg2[%c0_0] : memref<1xi32, #tpu.memory_space<smem>>
    %c-1_i32 = arith.constant -1 : i32
    %c0_i32 = arith.constant 0 : i32
    %c32_i32 = arith.constant 32 : i32
    %2 = arith.addi %c0_i32, %c32_i32 : i32
    %c1_i32 = arith.constant 1 : i32
    %3:2 = scf.for %arg9 = %c0_i32 to %2 step %c1_i32 iter_args(%arg10 = %c-1_i32, %arg11 = %1) -> (i32, i32)  : i32 {
      %42 = arith.subi %arg11, %arg10 : i32
      %c1_i32_19 = arith.constant 1 : i32
      %43 = arith.shrsi %42, %c1_i32_19 : i32
      %44 = arith.addi %arg10, %43 : i32
      %c0_i32_20 = arith.constant 0 : i32
      %45 = vector.broadcast %c0_i32_20 : i32 to vector<8x128xi32>
      %c0_i32_21 = arith.constant 0 : i32
      %c16_i32_22 = arith.constant 16 : i32
      %46 = arith.muli %c0_i32_21, %c16_i32_22 : i32
      %47 = tpu.assume_multiple %46, 16 : i32
      %48 = arith.index_cast %47 : i32 to index
      %c0_23 = arith.constant 0 : index
      %49 = vector.load %arg7[%48, %c0_23] : memref<16x128xf32, #tpu.memory_space<vmem>>, vector<16x128xf32>
      %50 = tpu.bitcast %49 : vector<16x128xf32> -> vector<16x128xi32>
      %51 = vector.broadcast %44 : i32 to vector<16x128xi32>
      %52 = arith.cmpi sgt, %50, %51 : vector<16x128xi32>
      %53 = arith.extui %52 : vector<16x128xi1> to vector<16x128xi32>
      %54 = vector.shape_cast %53 : vector<16x128xi32> to vector<2x8x128xi32>
      %cst_24 = arith.constant dense<0> : vector<8x128xi32>
      %55 = vector.multi_reduction <add>, %54, %cst_24 [0] : vector<2x8x128xi32> to vector<8x128xi32>
      %56 = arith.addi %45, %55 : vector<8x128xi32>
      %c1_i32_25 = arith.constant 1 : i32
      %57 = vector.shape_cast %56 : vector<8x128xi32> to vector<1x8x128xi32>
      %cst_26 = arith.constant dense<0> : vector<1xi32>
      %58 = vector.multi_reduction <add>, %57, %cst_26 [1, 2] : vector<1x8x128xi32> to vector<1xi32>
      %59 = vector.shape_cast %58 : vector<1xi32> to vector<1x1x1xi32>
      %60 = vector.extract %59[0, 0, 0] : i32 from vector<1x1x1xi32>
      %61 = arith.cmpi sge, %60, %0 : i32
      %62 = arith.select %61, %44, %arg10 : i32
      %63 = arith.select %61, %arg11, %44 : i32
      scf.yield %62, %63 : i32, i32
    }
    %c0_i32_1 = arith.constant 0 : i32
    %4 = vector.broadcast %c0_i32_1 : i32 to vector<8x128xi32>
    %cst = arith.constant 0.000000e+00 : f32
    %5 = vector.broadcast %cst : f32 to vector<8x128xf32>
    %c0_i32_2 = arith.constant 0 : i32
    %c16_i32 = arith.constant 16 : i32
    %6 = arith.muli %c0_i32_2, %c16_i32 : i32
    %7 = tpu.assume_multiple %6, 16 : i32
    %8 = arith.index_cast %7 : i32 to index
    %c0_3 = arith.constant 0 : index
    %9 = vector.load %arg7[%8, %c0_3] : memref<16x128xf32, #tpu.memory_space<vmem>>, vector<16x128xf32>
    %10 = tpu.bitcast %9 : vector<16x128xf32> -> vector<16x128xi32>
    %11 = vector.broadcast %3#0 : i32 to vector<16x128xi32>
    %12 = arith.cmpi sgt, %10, %11 : vector<16x128xi32>
    %13 = arith.extui %12 : vector<16x128xi1> to vector<16x128xi32>
    %14 = vector.shape_cast %13 : vector<16x128xi32> to vector<2x8x128xi32>
    %cst_4 = arith.constant dense<0> : vector<8x128xi32>
    %15 = vector.multi_reduction <add>, %14, %cst_4 [0] : vector<2x8x128xi32> to vector<8x128xi32>
    %16 = arith.addi %4, %15 : vector<8x128xi32>
    %cst_5 = arith.constant 0.000000e+00 : f32
    %17 = vector.broadcast %cst_5 : f32 to vector<16x128xf32>
    %18 = arith.select %12, %9, %17 : vector<16x128xi1>, vector<16x128xf32>
    %19 = vector.shape_cast %18 : vector<16x128xf32> to vector<2x8x128xf32>
    %cst_6 = arith.constant dense<0.000000e+00> : vector<8x128xf32>
    %20 = vector.multi_reduction <add>, %19, %cst_6 [0] : vector<2x8x128xf32> to vector<8x128xf32>
    %21 = arith.addf %5, %20 : vector<8x128xf32>
    %c1_i32_7 = arith.constant 1 : i32
    %c0_i32_8 = arith.constant 0 : i32
    %22 = vector.broadcast %c0_i32_8 : i32 to vector<8x128xi32>
    %23 = vector.broadcast %3#1 : i32 to vector<8x128xi32>
    %24 = arith.addi %22, %23 : vector<8x128xi32>
    %c0_9 = arith.constant 0 : index
    %c0_10 = arith.constant 0 : index
    %25 = vector.load %arg4[%c0_9, %c0_10] : memref<8x128xi32, #tpu.memory_space<vmem>>, vector<8x128xi32>
    tpu.vector_store %arg4[%c0_9, %c0_10], %24 {strides = array<i32>} : memref<8x128xi32, #tpu.memory_space<vmem>>, vector<8x128xi32>,
    %c0_i32_11 = arith.constant 0 : i32
    %26 = vector.broadcast %c0_i32_11 : i32 to vector<8x128xi32>
    %27 = vector.shape_cast %16 : vector<8x128xi32> to vector<1x8x128xi32>
    %cst_12 = arith.constant dense<0> : vector<1xi32>
    %28 = vector.multi_reduction <add>, %27, %cst_12 [1, 2] : vector<1x8x128xi32> to vector<1xi32>
    %29 = vector.shape_cast %28 : vector<1xi32> to vector<1x1x1xi32>
    %30 = vector.extract %29[0, 0, 0] : i32 from vector<1x1x1xi32>
    %31 = vector.broadcast %30 : i32 to vector<8x128xi32>
    %32 = arith.addi %26, %31 : vector<8x128xi32>
    %c0_13 = arith.constant 0 : index
    %c0_14 = arith.constant 0 : index
    %33 = vector.load %arg5[%c0_13, %c0_14] : memref<8x128xi32, #tpu.memory_space<vmem>>, vector<8x128xi32>
    tpu.vector_store %arg5[%c0_13, %c0_14], %32 {strides = array<i32>} : memref<8x128xi32, #tpu.memory_space<vmem>>, vector<8x128xi32>,
    %cst_15 = arith.constant 0.000000e+00 : f32
    %34 = vector.broadcast %cst_15 : f32 to vector<8x128xf32>
    %35 = vector.shape_cast %21 : vector<8x128xf32> to vector<1x8x128xf32>
    %cst_16 = arith.constant dense<0.000000e+00> : vector<1xf32>
    %36 = vector.multi_reduction <add>, %35, %cst_16 [1, 2] : vector<1x8x128xf32> to vector<1xf32>
    %37 = vector.shape_cast %36 : vector<1xf32> to vector<1x1x1xf32>
    %38 = vector.extract %37[0, 0, 0] : f32 from vector<1x1x1xf32>
    %39 = vector.broadcast %38 : f32 to vector<8x128xf32>
    %40 = arith.addf %34, %39 : vector<8x128xf32>
    %c0_17 = arith.constant 0 : index
    %c0_18 = arith.constant 0 : index
    %41 = vector.load %arg6[%c0_17, %c0_18] : memref<8x128xf32, #tpu.memory_space<vmem>>, vector<8x128xf32>
    tpu.vector_store %arg6[%c0_17, %c0_18], %40 {strides = array<i32>} : memref<8x128xf32, #tpu.memory_space<vmem>>, vector<8x128xf32>,
    return
  }
  func.func @transform_1(%arg0: i32, %arg1: memref<1xi32, #tpu.memory_space<smem>>, %arg2: memref<1xi32, #tpu.memory_space<smem>>) -> (i32, i32) {
    %c0_i32 = arith.constant 0 : i32
    %c0_i32_0 = arith.constant 0 : i32
    %c0_i32_1 = arith.constant 0 : i32
    return %c0_i32, %c0_i32_0 : i32, i32
  }
  func.func @transform_2(%arg0: i32, %arg1: memref<1xi32, #tpu.memory_space<smem>>, %arg2: memref<1xi32, #tpu.memory_space<smem>>) -> (i32, i32) {
    %c0_i32 = arith.constant 0 : i32
    %c0_i32_0 = arith.constant 0 : i32
    %c0_i32_1 = arith.constant 0 : i32
    return %c0_i32, %c0_i32_0 : i32, i32
  }
  func.func @transform_3(%arg0: i32, %arg1: memref<1xi32, #tpu.memory_space<smem>>, %arg2: memref<1xi32, #tpu.memory_space<smem>>) -> (i32, i32) {
    %c0_i32 = arith.constant 0 : i32
    %c0_i32_0 = arith.constant 0 : i32
    %c0_i32_1 = arith.constant 0 : i32
    return %c0_i32, %c0_i32_0 : i32, i32
  }
}

</mosaic_0001>

<bundles_post_ra>
// kernel: balance_nll_loss.3
= control target key start
LH: loop header
LB: loop body
LE: loop exit
PB: predicated region body
PF: predicated region fallthrough
CT: control target
= control target key end

     0   :  { %s335_s0 = inlined_call_operand.<no memory space> [shape: s32[1], index: 0, kind: input, shape index: {}]   ;;  %s336_s1 = inlined_call_operand.<no memory space> [shape: s32[1], index: 1, kind: input, shape index: {}]   ;;  %s337_s2 = inlined_call_operand.vmem [shape: f32[16,128], index: 2, kind: input, shape index: {}]   ;;  %s338_s3 = inlined_call_operand.vmem [shape: s32[8,128], index: 3, kind: output, shape index: {0}]   ;;  %s339_s4 = inlined_call_operand.vmem [shape: s32[8,128], index: 4, kind: output, shape index: {1}]   ;;  %s340_s5 = inlined_call_operand.vmem [shape: f32[8,128], index: 5, kind: output, shape index: {2}]  }
   0x1   :  { %v45_v0 = vld [vmem:[%s337_s2] sm:$0xff]  ;;  %v47_v1 = vld [vmem:[%s337_s2 + $0x8] sm:$0xff] }
   0x2   :  { %46 = vst [vmem:[#allocation2] sm:$0xff] %v45_v0  ;;  %48 = vst [vmem:[#allocation2 + $0x8] sm:$0xff] %v47_v1 }
   0x3   :  { %56 = vsyncadd [#allocation3], 256 }
   0x4   :  { %236 = dma.done.wait [#allocation3], 256 }
   0x5   :  { %237 = vsyncadd [#allocation3], 4294967040  ;;  %s293_s24 = smov 4294967295   ;;  %s295_s25 = smov 0  }
   0x6 LB: > { %s70_s2 = ssub.s32 %s240_s1, %s244_s24  ;;  %v250_v5 = vmov 0   ;;  %s67_s25 = sadd.s32 1, %s248_s25   ;;  %s248_s25 = sphi %s295_s25, %s67_s25   ;;  %s244_s24 = sphi %s293_s24, %s342_s24   ;;  %s240_s1 = sphi %s336_s1, %s341_s1  }
   0x7   : > { %s71_s26 = sshra.s32 %s70_s2, 1  ;;  %p64_p1 = scmp.ge.s32.totalorder %s67_s25, 32  }
   0x8   : > { %s309_s27 = sadd.s32 %s244_s24, %s71_s26  ;;  %v251_v28 = vmov (%p64_p1), 0  }
   0x9   : > { %v73_v2 = vld [vmem:[#allocation2] sm:$0xff]  ;;  %v74_v3 = vld [vmem:[#allocation2 + $0x8] sm:$0xff]  ;;  %v77_v4 = vstv %s309_s27 }
   0xa   : > { %vm78_vm0 = vcmp.gt.s32.totalorder %v73_v2, %v77_v4  ;;  %vm79_vm1 = vcmp.gt.s32.totalorder %v74_v3, %v77_v4  ;;  %v105_v25 = vld [vmem:[#allocation2] sm:$0xff] (%p64_p1)  ;;  %v106_v26 = vld [vmem:[#allocation2 + $0x8] sm:$0xff] (%p64_p1) }
   0xb   : > { %v80_v6 = vsel %vm78_vm0, 1, %v250_v5  ;;  %v81_v7 = vsel %vm79_vm1, 1, %v250_v5 }
   0xc   : > { %v82_v8 = vadd.s32 %v81_v7, %v80_v6 }
   0xe   : > { %v84_v9 = vshrl.u32 %v82_v8, 16  ;;  %v83_v10 = vand.u32 65535, %v82_v8 }
  0x10   : > { %v86_v11 = vcvt.s32.f32 %v84_v9  ;;  %v85_v12 = vcvt.s32.f32 %v83_v10 }
  0x12   : > { %89 = vadd.xlane.f32.xlu0 %v86_v11 }
  0x16   : > { %87 = vadd.xlane.f32.xlu0 %v85_v12 }
  0x9f   : > { %v90_v13 = vpop.xlane.xlu0 %89 }
  0xa0   : > { %v92_v14 = vcvt.f32.s32 %v90_v13 }
  0xa2   : > { %v93_v16 = vshll.u32 %v92_v14, 16 }
  0xa3   : > { %v88_v15 = vpop.xlane.xlu0 %87 }
  0xa4   : > { %v91_v17 = vcvt.f32.s32 %v88_v15 }
  0xa6   : > { %v94_v18 = vadd.s32 %v93_v16, %v91_v17 }
  0xa8   : > { %v95_v19 = vrot.slane %v94_v18, 4 }
  0xaa   : > { %v96_v20 = vadd.s32 %v95_v19, %v94_v18 }
  0xac   : > { %v97_v21 = vrot.slane %v96_v20, 2 }
  0xae   : > { %v98_v22 = vadd.s32 %v97_v21, %v96_v20 }
  0xb0   : > { %v99_v23 = vrot.slane %v98_v22, 1 }
  0xb2   : > { %v100_v24 = vadd.s32 %v99_v23, %v98_v22 }
  0xb4   : > { %192 = vpush %v100_v24 }
  0xe5   : > { %s193_s28 = spop %192  ;;  %66 = sbr.rel (!%p64_p1) target bundleno = 6 (0x6), region = 85 }
  0xe6   : > { %p102_p0 = scmp.ge.s32.totalorder %s193_s28, %s335_s0 }
  0xe8   : > { %s103_s6 = scalar_select %p102_p0, %s309_s27, %s244_s24  }
  0xe9   : > { %s104_s7 = scalar_select %p102_p0, %s240_s1, %s309_s27  }
  0xea   : > { %s342_s24 = smov %s103_s6  ;;  %v109_v27 = vstv (%p64_p1), %s103_s6 }
  0xeb   : > { %s341_s1 = smov %s104_s7  ;;  %vm110_vm2 = vcmp.gt.s32.totalorder (%p64_p1), %v105_v25, %v109_v27  ;;  %vm111_vm3 = vcmp.gt.s32.totalorder (%p64_p1), %v106_v26, %v109_v27  ;;  %v119_v39 = vstv (%p64_p1), %s104_s7 }
  0xec   :  { %v112_v29 = vsel %vm110_vm2, 1, %v251_v28  ;;  %v113_v30 = vsel %vm111_vm3, 1, %v251_v28  ;;  %v115_v31 = vsel %vm110_vm2, %v105_v25, 0.0  ;;  %v116_v32 = vsel %vm111_vm3, %v106_v26, 0.0  ;;  %120 = vst [vmem:[%s338_s3] sm:$0xff] %v119_v39 }
  0xed   :  { %v114_v33 = vadd.s32 %v113_v30, %v112_v29  ;;  %v117_v34 = vadd.f32 %v116_v32, %v115_v31 }
  0xef   :  { %v122_v35 = vshrl.u32 %v114_v33, 16  ;;  %142 = vadd.xlane.f32.xlu1 %v117_v34  ;;  %v121_v36 = vand.u32 65535, %v114_v33 }
  0xf1   :  { %v124_v37 = vcvt.s32.f32 %v122_v35  ;;  %v123_v38 = vcvt.s32.f32 %v121_v36 }
  0xf3   :  { %127 = vadd.xlane.f32.xlu0 %v124_v37 }
  0xf7   :  { %125 = vadd.xlane.f32.xlu0 %v123_v38 }
 0x17c   :  { %v143_v40 = vpop.xlane.xlu1 %142 }
 0x17d   :  { %v144_v42 = vrot.slane %v143_v40, 4 }
 0x17f   :  { %v145_v44 = vadd.f32 %v144_v42, %v143_v40 }
 0x180   :  { %v128_v41 = vpop.xlane.xlu0 %127 }
 0x181   :  { %v130_v43 = vcvt.f32.s32 %v128_v41  ;;  %v146_v49 = vrot.slane %v145_v44, 2 }
 0x183   :  { %v131_v46 = vshll.u32 %v130_v43, 16  ;;  %v147_v52 = vadd.f32 %v146_v49, %v145_v44 }
 0x184   :  { %v126_v45 = vpop.xlane.xlu0 %125 }
 0x185   :  { %v129_v47 = vcvt.f32.s32 %v126_v45  ;;  %v148_v55 = vrot.slane %v147_v52, 1 }
 0x187   :  { %v132_v48 = vadd.s32 %v131_v46, %v129_v47  ;;  %v149_v58 = vadd.f32 %v148_v55, %v147_v52 }
 0x189   :  { %v133_v50 = vrot.slane %v132_v48, 4 }
 0x18b   :  { %v134_v51 = vadd.s32 %v133_v50, %v132_v48 }
 0x18d   :  { %v135_v53 = vrot.slane %v134_v51, 2 }
 0x18f   :  { %v136_v54 = vadd.s32 %v135_v53, %v134_v51 }
 0x191   :  { %v137_v56 = vrot.slane %v136_v54, 1 }
 0x193   :  { %v138_v57 = vadd.s32 %v137_v56, %v136_v54 }
 0x195   :  { %194 = vpush %v138_v57 }
 0x196   :  { %196 = vpush %v149_v58 }
 0x1c6   :  { %s195_s3 = spop %194 }
 0x1c7   :  { %v140_v59 = vstv %s195_s3  ;;  %s197_s8 = spop %196 }
 0x1c8   :  { %141 = vst [vmem:[%s339_s4] sm:$0xff] %v140_v59  ;;  %v151_v60 = vstv %s197_s8 }
 0x1c9   :  { %153 = vst [vmem:[%s340_s5] sm:$0xff] %v151_v60 }
 0x1ca   :  { %166 = vsyncmov [#allocation3] }
 0x1cd   :  { %s167_s13 = vpop.sfrf %166 }
 0x1ce   :  { %p191_p2 = scmp.ne.s32.totalorder %s167_s13, 0 }
 0x1d0   :  { %171 = shalt.err (%p191_p2)  }

// kernel: balance_nll_loss.2
= control target key start
LH: loop header
LB: loop body
LE: loop exit
PB: predicated region body
PF: predicated region fallthrough
CT: control target
= control target key end

     0   :  { %s800_s21 = smov 0   ;;  %s802_s22 = smov 0   ;;  %s862_s0 = inlined_call_operand.vmem [shape: f32[2,2,8,128], index: 0, kind: input, shape index: {}]   ;;  %s863_s1 = inlined_call_operand.vmem [shape: s32[2,8,128], index: 1, kind: input, shape index: {}]   ;;  %s864_s2 = inlined_call_operand.vmem [shape: f32[2,8,128], index: 2, kind: output, shape index: {0}]   ;;  %s865_s3 = inlined_call_operand.vmem [shape: f32[2,8,128], index: 3, kind: output, shape index: {1}]   ;;  %s866_s4 = inlined_call_operand.vmem [shape: f32[2,8,128], index: 4, kind: output, shape index: {2}]   ;;  %s867_s5 = inlined_call_operand.vmem [shape: s32[2,8,128], index: 5, kind: output, shape index: {3}]   ;;  %s868_s6 = inlined_call_operand.vmem [shape: f32[2,8,128], index: 6, kind: output, shape index: {4}]  }
   0x1   :  { %s804_s23 = smov 0  }
   0x2 LB: > { %s29_s24 = sadd.s32 1, %s758_s22  ;;  %p690_p0 = scmp.ge.s32.totalorder %s762_s23, 1  ;;  %s762_s23 = sphi %s804_s23, %s17_s23   ;;  %s758_s22 = sphi %s802_s22, %s870_s22   ;;  %s754_s21 = sphi %s800_s21, %s869_s21  }
   0x3   : > { %p31_p1 = scmp.ge.s32.totalorder %s29_s24, 2  ;;  %p254_p2 = scmp.lt.s32.totalorder %s762_s23, 3 }
   0x5   : > { %s872_s24 = smov (%p31_p1, %s29_s24), 0  ;;  %p255_p3 = pnand %p690_p0, %p254_p2 }
   0x6   : > { %p312_p4 = scmp.lt.s32.totalorder (!%p255_p3), %s754_s21, 1  ;;  %v376_v0 = vlaneseq (!%p255_p3)  ;;  %v764_v10 = vmov (!%p255_p3), 0  }
   0x7   : > { %258 = sbr.rel (%p255_p3) target bundleno = 269 (0x10d), region = 28 }
   0x8   : > { %v377_v1 = vshrl.u32 (!%p255_p3), %v376_v0, 7  ;;  %v379_v2 = vand.u32 (!%p255_p3), 127, %v376_v0 }
   0xa   : > { %v381_v3 = vmul.u32 (!%p255_p3), 128, %v377_v1 }
   0xc   : > { %v384_v5 = vadd.s32 (!%p255_p3), %v381_v3, %v379_v2 }
   0xe   : > { %s874_s21 = smov (!%p312_p4, %s754_s21), 1  ;;  %vm385_vm1 = vcmp.lt.s32.totalorder %v384_v5, 256 }
   0xf   : > { %s818_s25 = sshll.u32 %s874_s21, 3  ;;  %s702_s26 = sshll.u32 %s874_s21, 4 }
  0x10   : > { %s326_s29 = scalar_lea.vmem %s863_s1, %s818_s25  ;;  %s319_s8 = scalar_lea.vmem %s862_s0, %s702_s26 }
  0x11   : > { %v361_v4 = vld [vmem:[%s326_s29] sm:$0xff]  ;;  %v699_v7 = vld [vmem:[%s319_s8 + $0x8] sm:$0xff]  ;;  %s333_s11 = scalar_lea.vmem %s864_s2, %s818_s25  ;;  %s337_s14 = scalar_lea.vmem %s865_s3, %s818_s25 }
  0x12   : > { %v358_v6 = vld [vmem:[%s319_s8] sm:$0xff]  ;;  %vm362_vm0 = vcmp.gt.s32.totalorder %v361_v4, 0  ;;  %s341_s18 = scalar_lea.vmem %s866_s4, %s818_s25  ;;  %s345_s26 = scalar_lea.vmem %s867_s5, %s818_s25 }
  0x13   : > { %v363_v8 = vsub.f32 %v358_v6, %v699_v7  ;;  %vm388_vm2 = vmand %vm385_vm1, %vm362_vm0  ;;  %s349_s30 = scalar_lea.vmem %s868_s6, %s818_s25 }
  0x14   : > { %v400_v11 = vsel %vm388_vm2, 1, %v764_v10 }
  0x15   : > { %v365_v9 = vand.u32 2147483647, %v363_v8  ;;  %v437_v12 = vshrl.u32 %v400_v11, 16  ;;  %v436_v13 = vand.u32 65535, %v400_v11  ;;  %v364_v20 = vmax.f32 %v363_v8, 0.0 }
  0x17   : > { %v366_v14 = vsub.f32 0.0, %v365_v9  ;;  %v439_v15 = vcvt.s32.f32 %v437_v12  ;;  %v438_v17 = vcvt.s32.f32 %v436_v13 }
  0x19   : > { %v367_v16 = vmul.f32 1.442695, %v366_v14  ;;  %442 = vadd.xlane.f32.xlu0 %v439_v15 }
  0x1b   : > { %736 = vpow2.f32 %v367_v16 }
  0x1d   : > { %440 = vadd.xlane.f32.xlu0 %v438_v17 }
  0x25   : > { %v737_v18 = vpop.eup %736 }
  0x26   : > { %v369_v19 = vadd.f32 1.0, %v737_v18 }
  0x28   : > { %738 = vlog2.f32 %v369_v19 }
  0x32   : > { %v739_v21 = vpop.eup %738 }
  0x33   : > { %v371_v22 = vmul.f32 0.6931472, %v739_v21 }
  0x35   : > { %v372_v23 = vadd.f32 %v371_v22, %v364_v20 }
  0x37   : > { %v374_v24 = vsel %vm362_vm0, %v372_v23, 0.0  ;;  %v373_v25 = vsub.f32 %v372_v23, %v363_v8 }
  0x38   : > { %v386_v26 = vsel %vm385_vm1, %v374_v24, 0.0 }
  0x39   : > { %410 = vadd.xlane.f32.xlu1 %v386_v26  ;;  %v375_v27 = vsel %vm362_vm0, 0.0, %v373_v25 }
  0x3a   : > { %v387_v28 = vsel %vm385_vm1, %v375_v27, 0.0 }
  0x3b   : > { %v404_v29 = vmax.f32 %v387_v28, 0.0  ;;  %390 = vst [vmem:[%s333_s11] sm:$0xff] %v387_v28  ;;  %v389_v30 = vadd.f32 %v387_v28, %v386_v26 }
  0x3d   : > { %458 = vmax.xlane.f32.xlu0 %v404_v29  ;;  %423 = vadd.xlane.f32.xlu1 %v389_v30 }
  0xa6   : > { %v443_v31 = vpop.xlane.xlu0 %442 }
  0xa7   : > { %v445_v32 = vcvt.f32.s32 %v443_v31 }
  0xa9   : > { %v446_v34 = vshll.u32 %v445_v32, 16 }
  0xaa   : > { %v441_v33 = vpop.xlane.xlu0 %440 }
  0xab   : > { %v444_v35 = vcvt.f32.s32 %v441_v33 }
  0xad   : > { %v447_v36 = vadd.s32 %v446_v34, %v444_v35 }
  0xaf   : > { %v448_v37 = vrot.slane %v447_v36, 4 }
  0xb1   : > { %v449_v38 = vadd.s32 %v448_v37, %v447_v36 }
  0xb3   : > { %v450_v44 = vrot.slane %v449_v38, 2 }
  0xb5   : > { %v451_v51 = vadd.s32 %v450_v44, %v449_v38 }
  0xb7   : > { %v452_v58 = vrot.slane %v451_v51, 1 }
  0xb9   : > { %v453_v63 = vadd.s32 %v452_v58, %v451_v51 }
  0xc6   : > { %v411_v39 = vpop.xlane.xlu1 %410 }
  0xc7   : > { %v412_v40 = vrot.slane %v411_v39, 4 }
  0xc9   : > { %v413_v41 = vadd.f32 %v412_v40, %v411_v39 }
  0xca   : > { %v459_v42 = vpop.xlane.xlu0 %458  ;;  %v424_v43 = vpop.xlane.xlu1 %423 }
  0xcb   : > { %v414_v45 = vrot.slane %v413_v41, 2  ;;  %v460_v46 = vrot.slane %v459_v42, 4  ;;  %v425_v47 = vrot.slane %v424_v43, 4 }
  0xcd   : > { %v461_v48 = vmax.f32 %v459_v42, %v460_v46  ;;  %v426_v49 = vadd.f32 %v425_v47, %v424_v43  ;;  %v415_v50 = vadd.f32 %v414_v45, %v413_v41 }
  0xcf   : > { %v462_v52 = vrot.slane %v461_v48, 2  ;;  %v427_v53 = vrot.slane %v426_v49, 2  ;;  %v416_v54 = vrot.slane %v415_v50, 1 }
  0xd1   : > { %v463_v55 = vmax.f32 %v461_v48, %v462_v52  ;;  %v428_v56 = vadd.f32 %v427_v53, %v426_v49  ;;  %v417_v57 = vadd.f32 %v416_v54, %v415_v50 }
  0xd3   : > { %703 = vpush %v417_v57  ;;  %v429_v59 = vrot.slane %v428_v56, 1  ;;  %v464_v60 = vrot.slane %v463_v55, 1 }
  0xd5   : > { %v430_v61 = vadd.f32 %v429_v59, %v428_v56  ;;  %v465_v62 = vmax.f32 %v463_v55, %v464_v60 }
  0xd7   : > { %705 = vpush %v430_v61 }
  0xd8   : > { %707 = vpush %v453_v63 }
  0xd9   : > { %709 = vpush %v465_v62 }
 0x104   : > { %s704_s15 = spop %703 }
 0x105   : > { %v419_v0 = vstv %s704_s15 }
 0x106   : > { %421 = vst [vmem:[%s337_s14] sm:$0xff] %v419_v0 }
 0x108   : > { %s706_s19 = spop %705 }
 0x109   : > { %v432_v1 = vstv %s706_s19  ;;  %s708_s27 = spop %707 }
 0x10a   : > { %434 = vst [vmem:[%s341_s18] sm:$0xff] %v432_v1  ;;  %v455_v2 = vstv %s708_s27  ;;  %s710_s7 = spop %709 }
 0x10b   : > { %456 = vst [vmem:[%s345_s26] sm:$0xff] %v455_v2  ;;  %v467_v3 = vstv %s710_s7 }
 0x10c   : > { %469 = vst [vmem:[%s349_s30] sm:$0xff] %v467_v3 }
 0x10d PF: > { %s17_s23 = sadd.s32 1, %s762_s23   ;;  %s869_s21 = smov %s758_s22 }
 0x10e   : > { %p14_p5 = scmp.ge.s32.totalorder %s17_s23, 4   ;;  %s870_s22 = smov %s872_s24 }
 0x110   :  { %16 = sbr.rel (!%p14_p5) target bundleno = 2 (0x2), region = 118 }

</bundles_post_ra>
